<compile_context>
chip_gen: v6e
topology: v6e:2x2x1
jax: 0.10.0
libtpu: 0.0.40
codegen_flags: <defaults>
</compile_context>

<pallas_src>
import jax
import jax.numpy as jnp
from jax.experimental import pallas as pl
from jax.experimental.pallas import tpu as pltpu

E_CHAR = 50   # fixed by the module (self.e_char = 50)
K_CONV = 5    # CNN kernel size used in assignment 5


def _round_up(x, m):
    return ((x + m - 1) // m) * m


def char_cnn_embed_kernel(x_ref, wc_ref, bc_ref, whw_ref, bhw_ref, o_ref):
    # x_ref  : (TILE_N, MWL*e_char)      bf16  flattened char embeddings (time-major within a row)
    # wc_ref : (K*e_char, e_pad)         bf16  flattened conv taps, output lane-padded
    # bc_ref : (1, e_pad)                f32
    # whw_ref: (e_pad, 2*e_pad)          bf16  [W_proj | W_gate] fused, lane-padded
    # bhw_ref: (1, 2*e_pad)              f32
    # o_ref  : (TILE_N, e_pad)           f32
    kec, e_pad = wc_ref.shape
    mwl = x_ref.shape[1] // E_CHAR
    l_out = mwl - K_CONV + 1

    wc = wc_ref[...]                                    # resident across the t loop

    def window_dot(t):
        # conv timestep t as one matmul with contraction dim K*e_char
        win = x_ref[:, t * E_CHAR: t * E_CHAR + kec]    # (TILE_N, K*e_char)
        return jnp.dot(win, wc, preferred_element_type=jnp.float32)

    # max-pool over time (running max; l_out is small and static)
    pooled = window_dot(0)
    for t in range(1, l_out):
        pooled = jnp.maximum(pooled, window_dot(t))
    # bias + ReLU fused once after the max (relu(max_t(c)) == max(0, max_t(c)) and bias is t-invariant)
    pooled = jnp.maximum(pooled + bc_ref[...], 0.0)     # (TILE_N, e_pad) f32

    # Highway, fused into a single matmul: hw = pooled @ [W_proj | W_gate] + [b_p | b_g]
    hw = jnp.dot(pooled.astype(jnp.bfloat16), whw_ref[...],
                 preferred_element_type=jnp.float32) + bhw_ref[...]
    proj = jnp.maximum(hw[:, :e_pad], 0.0)
    gate = jax.nn.sigmoid(hw[:, e_pad:])

    # Dropout(0.3): identity under eval semantics.
    # TODO(synk): training-mode stochastic dropout (pltpu.prng_seed + pltpu.prng_random_bits).
    o_ref[...] = (gate * proj + (1.0 - gate) * pooled).astype(o_ref.dtype)


def model_embeddings_forward(input_ids, params):
    """input_ids: (sentence_length, batch_size, max_word_length) int32
       returns  : (sentence_length, batch_size, word_embed_size) float32"""
    sl, b, mwl = input_ids.shape
    assert mwl >= K_CONV, "max_word_length must be >= conv kernel size"
    n = sl * b
    e_word = params["e_word"]
    kec, e_pad = params["w_conv"].shape

    # Embedding lookup (gather) in JAX glue; pad row is zero.  No transpose round-trip:
    # just a trailing-dim flatten to (N, MWL*e_char), cast to bf16 for the MXU.
    x = jnp.take(params["embedding"], input_ids.reshape(n, mwl), axis=0)   # (N, MWL, e_char)
    x = x.reshape(n, mwl * E_CHAR).astype(jnp.bfloat16)

    # Tile N; keep tiles VMEM-friendly on all generations (v7x has 64 MiB VMEM).
    tile_n = min(512, _round_up(n, 8))
    n_pad = _round_up(n, tile_n)
    if n_pad != n:
        x = jnp.pad(x, ((0, n_pad - n), (0, 0)))

    out = pl.pallas_call(
        char_cnn_embed_kernel,
        out_shape=jax.ShapeDtypeStruct((n_pad, e_pad), jnp.float32),
        grid=(n_pad // tile_n,),
        in_specs=[
            pl.BlockSpec((tile_n, mwl * E_CHAR), lambda i: (i, 0)),   # x: tiled over N
            pl.BlockSpec((kec, e_pad), lambda i: (0, 0)),             # conv weight: resident
            pl.BlockSpec((1, e_pad), lambda i: (0, 0)),               # conv bias
            pl.BlockSpec((e_pad, 2 * e_pad), lambda i: (0, 0)),       # fused highway weight
            pl.BlockSpec((1, 2 * e_pad), lambda i: (0, 0)),           # fused highway bias
        ],
        out_specs=pl.BlockSpec((tile_n, e_pad), lambda i: (i, 0)),
        compiler_params=pltpu.CompilerParams(dimension_semantics=("parallel",)),
    )(x, params["w_conv"], params["b_conv"], params["w_hw"], params["b_hw"])

    return out[:n, :e_word].reshape(sl, b, e_word)


def init_params(key, vocab_size, word_embed_size, pad_idx=0):
    ks = jax.random.split(key, 7)
    e_word = word_embed_size
    e_pad = _round_up(e_word, 128)

    emb = 0.1 * jax.random.normal(ks[0], (vocab_size, E_CHAR), jnp.float32)
    emb = emb.at[pad_idx].set(0.0)                                  # padding_idx row is zero

    # PyTorch-layout parameters (for the reference)
    w_conv_pt = 0.05 * jax.random.normal(ks[1], (e_word, E_CHAR, K_CONV), jnp.float32)
    b_conv_pt = 0.05 * jax.random.normal(ks[2], (e_word,), jnp.float32)
    w_proj_pt = 0.05 * jax.random.normal(ks[3], (e_word, e_word), jnp.float32)
    b_proj_pt = 0.05 * jax.random.normal(ks[4], (e_word,), jnp.float32)
    w_gate_pt = 0.05 * jax.random.normal(ks[5], (e_word, e_word), jnp.float32)
    b_gate_pt = 0.05 * jax.random.normal(ks[6], (e_word,), jnp.float32)

    # Kernel layout: flattened conv taps (j,c) -> row j*e_char+c, output lane-padded to 128
    wc_flat = jnp.transpose(w_conv_pt, (2, 1, 0)).reshape(K_CONV * E_CHAR, e_word)
    w_conv = jnp.zeros((K_CONV * E_CHAR, e_pad), jnp.float32).at[:, :e_word].set(wc_flat)
    b_conv = jnp.zeros((1, e_pad), jnp.float32).at[:, :e_word].set(b_conv_pt)

    # Fused highway weight [W_proj | W_gate] in (in, out) layout, lane-padded
    w_hw = jnp.zeros((e_pad, 2 * e_pad), jnp.float32)
    w_hw = w_hw.at[:e_word, :e_word].set(w_proj_pt.T)
    w_hw = w_hw.at[:e_word, e_pad:e_pad + e_word].set(w_gate_pt.T)
    b_hw = jnp.zeros((1, 2 * e_pad), jnp.float32)
    b_hw = b_hw.at[:, :e_word].set(b_proj_pt)
    b_hw = b_hw.at[:, e_pad:e_pad + e_word].set(b_gate_pt)

    return dict(
        embedding=emb, e_word=e_word,
        w_conv=w_conv.astype(jnp.bfloat16), b_conv=b_conv,
        w_hw=w_hw.astype(jnp.bfloat16), b_hw=b_hw,
        # PyTorch-layout copies kept for the pure-JAX reference
        w_conv_pt=w_conv_pt, b_conv_pt=b_conv_pt,
        w_proj_pt=w_proj_pt, b_proj_pt=b_proj_pt,
        w_gate_pt=w_gate_pt, b_gate_pt=b_gate_pt,
    )


def reference_forward(input_ids, params):
    """Pure-JAX f32 reference matching the PyTorch forward (eval mode)."""
    sl, b, mwl = input_ids.shape
    n = sl * b
    x = jnp.take(params["embedding"], input_ids.reshape(n, mwl), axis=0)    # (N, MWL, e_char)
    w = params["w_conv_pt"]                                                 # (e_word, e_char, K)
    l_out = mwl - K_CONV + 1
    conv = jnp.stack(
        [sum(x[:, t + j, :] @ w[:, :, j].T for j in range(K_CONV)) + params["b_conv_pt"]
         for t in range(l_out)], axis=1)                                    # (N, L_out, e_word)
    pooled = jnp.max(jax.nn.relu(conv), axis=1)
    proj = jax.nn.relu(pooled @ params["w_proj_pt"].T + params["b_proj_pt"])
    gate = jax.nn.sigmoid(pooled @ params["w_gate_pt"].T + params["b_gate_pt"])
    hw = gate * proj + (1.0 - gate) * pooled
    return hw.reshape(sl, b, -1)


if __name__ == "__main__":
    key = jax.random.PRNGKey(0)
    k_ids, k_params = jax.random.split(key)

    SENT_LEN, BATCH, MAX_WORD_LEN = 4, 2, 12
    CHAR_VOCAB, WORD_EMBED_SIZE = 30, 32

    input_ids = jax.random.randint(k_ids, (SENT_LEN, BATCH, MAX_WORD_LEN),
                                   0, CHAR_VOCAB, dtype=jnp.int32)
    params = init_params(k_params, CHAR_VOCAB, WORD_EMBED_SIZE)

    out = jax.block_until_ready(model_embeddings_forward(input_ids, params))
    ref = reference_forward(input_ids, params)

    assert out.shape == (SENT_LEN, BATCH, WORD_EMBED_SIZE)
    # bf16 matmuls with f32 accumulation vs f32 reference -> loose-ish tolerance
    err = float(jnp.max(jnp.abs(out - ref)))
    assert jnp.allclose(out, ref, atol=2e-2, rtol=2e-2), f"max abs err = {err}"
    print("KERNEL_OK")
</pallas_src>

<mosaic_0001>
module attributes {stable_mosaic.version = 11 : i64} {
  func.func @char_cnn_embed_kernel(%arg0: i32, %arg1: memref<8x600xbf16, #tpu.memory_space<vmem>>, %arg2: memref<250x128xbf16, #tpu.memory_space<vmem>>, %arg3: memref<1x128xf32, #tpu.memory_space<vmem>>, %arg4: memref<128x256xbf16, #tpu.memory_space<vmem>>, %arg5: memref<1x256xf32, #tpu.memory_space<vmem>>, %arg6: memref<8x128xf32, #tpu.memory_space<vmem>>) attributes {dimension_semantics = [#tpu.dimension_semantics<parallel>], iteration_bounds = array<i64: 1>, scalar_prefetch = 0 : i64, scratch_operands = 0 : i64, tpu.core_type = #tpu.core_type<tc>, window_params = [{transform_indices = @transform_0, window_bounds = array<i64: 8, 600>}, {pipeline_mode = #tpu.pipeline_mode<synchronous>, transform_indices = @transform_1, window_bounds = array<i64: 250, 128>}, {pipeline_mode = #tpu.pipeline_mode<synchronous>, transform_indices = @transform_2, window_bounds = array<i64: 1, 128>}, {pipeline_mode = #tpu.pipeline_mode<synchronous>, transform_indices = @transform_3, window_bounds = array<i64: 128, 256>}, {pipeline_mode = #tpu.pipeline_mode<synchronous>, transform_indices = @transform_4, window_bounds = array<i64: 1, 256>}, {transform_indices = @transform_5, window_bounds = array<i64: 8, 128>}]} {
    %c0 = arith.constant 0 : index
    %c0_0 = arith.constant 0 : index
    %0 = vector.load %arg2[%c0, %c0_0] : memref<250x128xbf16, #tpu.memory_space<vmem>>, vector<250x128xbf16>
    %c0_1 = arith.constant 0 : index
    %c0_2 = arith.constant 0 : index
    %1 = vector.load %arg1[%c0_1, %c0_2] : memref<8x600xbf16, #tpu.memory_space<vmem>>, vector<8x250xbf16>
    %cst = arith.constant dense<0.000000e+00> : vector<8x128xf32>
    %2 = tpu.matmul %1, %0, %cst {dimension_numbers = #tpu.dot_dimension_numbers<[1], [0], [0], [1], [0, 0, 1, 1], [], []>} : vector<8x250xbf16>, vector<250x128xbf16>, vector<8x128xf32> -> vector<8x128xf32>
    %c0_3 = arith.constant 0 : index
    %c50 = arith.constant 50 : index
    %3 = vector.load %arg1[%c0_3, %c50] : memref<8x600xbf16, #tpu.memory_space<vmem>>, vector<8x250xbf16>
    %cst_4 = arith.constant dense<0.000000e+00> : vector<8x128xf32>
    %4 = tpu.matmul %3, %0, %cst_4 {dimension_numbers = #tpu.dot_dimension_numbers<[1], [0], [0], [1], [0, 0, 1, 1], [], []>} : vector<8x250xbf16>, vector<250x128xbf16>, vector<8x128xf32> -> vector<8x128xf32>
    %5 = arith.maximumf %2, %4 : vector<8x128xf32>
    %c0_5 = arith.constant 0 : index
    %c100 = arith.constant 100 : index
    %6 = vector.load %arg1[%c0_5, %c100] : memref<8x600xbf16, #tpu.memory_space<vmem>>, vector<8x250xbf16>
    %cst_6 = arith.constant dense<0.000000e+00> : vector<8x128xf32>
    %7 = tpu.matmul %6, %0, %cst_6 {dimension_numbers = #tpu.dot_dimension_numbers<[1], [0], [0], [1], [0, 0, 1, 1], [], []>} : vector<8x250xbf16>, vector<250x128xbf16>, vector<8x128xf32> -> vector<8x128xf32>
    %8 = arith.maximumf %5, %7 : vector<8x128xf32>
    %c0_7 = arith.constant 0 : index
    %c150 = arith.constant 150 : index
    %9 = vector.load %arg1[%c0_7, %c150] : memref<8x600xbf16, #tpu.memory_space<vmem>>, vector<8x250xbf16>
    %cst_8 = arith.constant dense<0.000000e+00> : vector<8x128xf32>
    %10 = tpu.matmul %9, %0, %cst_8 {dimension_numbers = #tpu.dot_dimension_numbers<[1], [0], [0], [1], [0, 0, 1, 1], [], []>} : vector<8x250xbf16>, vector<250x128xbf16>, vector<8x128xf32> -> vector<8x128xf32>
    %11 = arith.maximumf %8, %10 : vector<8x128xf32>
    %c0_9 = arith.constant 0 : index
    %c200 = arith.constant 200 : index
    %12 = vector.load %arg1[%c0_9, %c200] : memref<8x600xbf16, #tpu.memory_space<vmem>>, vector<8x250xbf16>
    %cst_10 = arith.constant dense<0.000000e+00> : vector<8x128xf32>
    %13 = tpu.matmul %12, %0, %cst_10 {dimension_numbers = #tpu.dot_dimension_numbers<[1], [0], [0], [1], [0, 0, 1, 1], [], []>} : vector<8x250xbf16>, vector<250x128xbf16>, vector<8x128xf32> -> vector<8x128xf32>
    %14 = arith.maximumf %11, %13 : vector<8x128xf32>
    %c0_11 = arith.constant 0 : index
    %c250 = arith.constant 250 : index
    %15 = vector.load %arg1[%c0_11, %c250] : memref<8x600xbf16, #tpu.memory_space<vmem>>, vector<8x250xbf16>
    %cst_12 = arith.constant dense<0.000000e+00> : vector<8x128xf32>
    %16 = tpu.matmul %15, %0, %cst_12 {dimension_numbers = #tpu.dot_dimension_numbers<[1], [0], [0], [1], [0, 0, 1, 1], [], []>} : vector<8x250xbf16>, vector<250x128xbf16>, vector<8x128xf32> -> vector<8x128xf32>
    %17 = arith.maximumf %14, %16 : vector<8x128xf32>
    %c0_13 = arith.constant 0 : index
    %c300 = arith.constant 300 : index
    %18 = vector.load %arg1[%c0_13, %c300] : memref<8x600xbf16, #tpu.memory_space<vmem>>, vector<8x250xbf16>
    %cst_14 = arith.constant dense<0.000000e+00> : vector<8x128xf32>
    %19 = tpu.matmul %18, %0, %cst_14 {dimension_numbers = #tpu.dot_dimension_numbers<[1], [0], [0], [1], [0, 0, 1, 1], [], []>} : vector<8x250xbf16>, vector<250x128xbf16>, vector<8x128xf32> -> vector<8x128xf32>
    %20 = arith.maximumf %17, %19 : vector<8x128xf32>
    %c0_15 = arith.constant 0 : index
    %c350 = arith.constant 350 : index
    %21 = vector.load %arg1[%c0_15, %c350] : memref<8x600xbf16, #tpu.memory_space<vmem>>, vector<8x250xbf16>
    %cst_16 = arith.constant dense<0.000000e+00> : vector<8x128xf32>
    %22 = tpu.matmul %21, %0, %cst_16 {dimension_numbers = #tpu.dot_dimension_numbers<[1], [0], [0], [1], [0, 0, 1, 1], [], []>} : vector<8x250xbf16>, vector<250x128xbf16>, vector<8x128xf32> -> vector<8x128xf32>
    %23 = arith.maximumf %20, %22 : vector<8x128xf32>
    %c0_17 = arith.constant 0 : index
    %c0_18 = arith.constant 0 : index
    %24 = vector.load %arg3[%c0_17, %c0_18] : memref<1x128xf32, #tpu.memory_space<vmem>>, vector<1x128xf32>
    %25 = vector.broadcast %24 : vector<1x128xf32> to vector<8x128xf32>
    %26 = arith.addf %23, %25 : vector<8x128xf32>
    %cst_19 = arith.constant 0.000000e+00 : f32
    %27 = vector.broadcast %cst_19 : f32 to vector<8x128xf32>
    %28 = arith.maximumf %26, %27 : vector<8x128xf32>
    %29 = arith.truncf %28 : vector<8x128xf32> to vector<8x128xbf16>
    %c0_20 = arith.constant 0 : index
    %c0_21 = arith.constant 0 : index
    %30 = vector.load %arg4[%c0_20, %c0_21] : memref<128x256xbf16, #tpu.memory_space<vmem>>, vector<128x256xbf16>
    %cst_22 = arith.constant dense<0.000000e+00> : vector<8x256xf32>
    %31 = tpu.matmul %29, %30, %cst_22 {dimension_numbers = #tpu.dot_dimension_numbers<[1], [0], [0], [1], [0, 0, 1, 1], [], []>} : vector<8x128xbf16>, vector<128x256xbf16>, vector<8x256xf32> -> vector<8x256xf32>
    %c0_23 = arith.constant 0 : index
    %c0_24 = arith.constant 0 : index
    %32 = vector.load %arg5[%c0_23, %c0_24] : memref<1x256xf32, #tpu.memory_space<vmem>>, vector<1x256xf32>
    %33 = vector.broadcast %32 : vector<1x256xf32> to vector<8x256xf32>
    %34 = arith.addf %31, %33 : vector<8x256xf32>
    %35 = vector.extract_strided_slice %34 {offsets = [0, 0], sizes = [8, 128], strides = [1, 1]} : vector<8x256xf32> to vector<8x128xf32>
    %cst_25 = arith.constant 0.000000e+00 : f32
    %36 = vector.broadcast %cst_25 : f32 to vector<8x128xf32>
    %37 = arith.maximumf %35, %36 : vector<8x128xf32>
    %38 = vector.extract_strided_slice %34 {offsets = [0, 128], sizes = [8, 128], strides = [1, 1]} : vector<8x256xf32> to vector<8x128xf32>
    %39 = arith.negf %38 : vector<8x128xf32>
    %40 = math.exp %39 : vector<8x128xf32>
    %cst_26 = arith.constant 1.000000e+00 : f32
    %41 = vector.broadcast %cst_26 : f32 to vector<8x128xf32>
    %42 = arith.addf %41, %40 : vector<8x128xf32>
    %43 = arith.divf %41, %42 : vector<8x128xf32>
    %44 = arith.mulf %43, %37 : vector<8x128xf32>
    %cst_27 = arith.constant 1.000000e+00 : f32
    %45 = vector.broadcast %cst_27 : f32 to vector<8x128xf32>
    %46 = arith.subf %45, %43 : vector<8x128xf32>
    %47 = arith.mulf %46, %28 : vector<8x128xf32>
    %48 = arith.addf %44, %47 : vector<8x128xf32>
    %c0_28 = arith.constant 0 : index
    %c0_29 = arith.constant 0 : index
    %49 = vector.load %arg6[%c0_28, %c0_29] : memref<8x128xf32, #tpu.memory_space<vmem>>, vector<8x128xf32>
    tpu.vector_store %arg6[%c0_28, %c0_29], %48 {strides = array<i32>} : memref<8x128xf32, #tpu.memory_space<vmem>>, vector<8x128xf32>,
    return
  }
  func.func @transform_0(%arg0: i32) -> (i32, i32) {
    %c0_i32 = arith.constant 0 : i32
    %c0_i32_0 = arith.constant 0 : i32
    return %arg0, %c0_i32 : i32, i32
  }
  func.func @transform_1(%arg0: i32) -> (i32, i32) {
    %c0_i32 = arith.constant 0 : i32
    %c0_i32_0 = arith.constant 0 : i32
    %c0_i32_1 = arith.constant 0 : i32
    return %c0_i32, %c0_i32_0 : i32, i32
  }
  func.func @transform_2(%arg0: i32) -> (i32, i32) {
    %c0_i32 = arith.constant 0 : i32
    %c0_i32_0 = arith.constant 0 : i32
    %c0_i32_1 = arith.constant 0 : i32
    return %c0_i32, %c0_i32_0 : i32, i32
  }
  func.func @transform_3(%arg0: i32) -> (i32, i32) {
    %c0_i32 = arith.constant 0 : i32
    %c0_i32_0 = arith.constant 0 : i32
    %c0_i32_1 = arith.constant 0 : i32
    return %c0_i32, %c0_i32_0 : i32, i32
  }
  func.func @transform_4(%arg0: i32) -> (i32, i32) {
    %c0_i32 = arith.constant 0 : i32
    %c0_i32_0 = arith.constant 0 : i32
    %c0_i32_1 = arith.constant 0 : i32
    return %c0_i32, %c0_i32_0 : i32, i32
  }
  func.func @transform_5(%arg0: i32) -> (i32, i32) {
    %c0_i32 = arith.constant 0 : i32
    %c0_i32_0 = arith.constant 0 : i32
    return %arg0, %c0_i32 : i32, i32
  }
}

</mosaic_0001>

<bundles_post_ra>
// kernel: tpu_custom_call.1
= control target key start
LH: loop header
LB: loop body
LE: loop exit
PB: predicated region body
PF: predicated region fallthrough
CT: control target
= control target key end

     0   :  { %10 = vsyncpa [#allocation3], 0  ;;  %s1485_s0 = inlined_call_operand.hbm [shape: bf16[8,600], index: 0, kind: input, shape index: {}]   ;;  %s1486_s1 = inlined_call_operand.hbm [shape: bf16[250,128], index: 1, kind: input, shape index: {}]   ;;  %s1487_s2 = inlined_call_operand.vmem [shape: f32[1,128], index: 2, kind: input, shape index: {}]   ;;  %s1488_s3 = inlined_call_operand.hbm [shape: bf16[128,256], index: 3, kind: input, shape index: {}]   ;;  %s1489_s4 = inlined_call_operand.vmem [shape: f32[1,256], index: 4, kind: input, shape index: {}]   ;;  %s1490_s5 = inlined_call_operand.hbm [shape: f32[8,128], index: 5, kind: output, shape index: {}]  }
   0x1   :  { %11 = vsyncpa [#allocation6], 0 }
   0x2   :  { %12 = vsyncpa [#allocation4], 0  ;;  %s1230_s18 = smov [#allocation5]  }
   0x3   :  { %s28_s19 = sshll.u32 %s1230_s18, 4  ;;  %s29_s19 = int_to_ptr.vmem [resolvable:$true] %s28_s19 }
   0x4   :  { %s1152_s20 = scalar_lea.vmem %s29_s19, 2048  ;;  %p1157_p1 = scmp.lt.s32.totalorder %s29_s19, %s29_s19 }
   0x5   :  { %p1153_p0 = scmp.ne.s32.totalorder %s29_s19, %s1152_s20  ;;  %p1158_p2 = scmp.lt.s32.totalorder %s1152_s20, %s1152_s20 }
   0x7   :  { %p1159_p3 = por %p1158_p2, %p1157_p1 }
   0x9   :  { %p1160_p4 = pnand %p1159_p3, %p1153_p0 }
   0xb   :  { %1163 = shalt.err (!%p1160_p4)
}
   0xc   :  { %s1231_s21 = smov 64   ;;  %s1232_s22 = smov 4  }
   0xd   :  { %34 = dma.hbm_to_vmem [thread:$0]  %s1486_s1, 2048, %s29_s19, [#allocation6], %s1231_s21, %s1231_s21, %s1232_s22  }
   0xe   :  { %s1233_s25 = smov [#allocation2]   ;;  %s1234_s27 = smov [#allocation7]  }
   0xf   :  { %s19_s26 = sshll.u32 %s1233_s25, 4  ;;  %s42_s28 = sshll.u32 %s1234_s27, 4  ;;  %s20_s26 = int_to_ptr.vmem [resolvable:$true] %s19_s26  ;;  %s43_s28 = int_to_ptr.vmem [resolvable:$true] %s42_s28 }
  0x10   :  { %s1172_s29 = scalar_lea.vmem %s20_s26, 320  ;;  %p1177_p6 = scmp.lt.s32.totalorder %s20_s26, %s20_s26 }
  0x11   :  { %p1173_p5 = scmp.ne.s32.totalorder %s20_s26, %s1172_s29  ;;  %p1178_p7 = scmp.lt.s32.totalorder %s1172_s29, %s1172_s29 }
  0x13   :  { %p1179_p8 = por %p1178_p7, %p1177_p6 }
  0x15   :  { %p1180_p9 = pnand %p1179_p8, %p1173_p5 }
  0x17   :  { %1183 = shalt.err (!%p1180_p9)
}
  0x18   :  { %22 = dma.hbm_to_vmem [thread:$0]  %s1485_s0, 320, %s20_s26, [#allocation3]  }
  0x19   :  { %s1192_s7 = scalar_lea.vmem %s43_s28, 2048  ;;  %p1197_p11 = scmp.lt.s32.totalorder %s43_s28, %s43_s28 }
  0x1a   :  { %p1193_p10 = scmp.ne.s32.totalorder %s43_s28, %s1192_s7  ;;  %p1198_p12 = scmp.lt.s32.totalorder %s1192_s7, %s1192_s7 }
  0x1c   :  { %p1199_p13 = por %p1198_p12, %p1197_p11 }
  0x1e   :  { %p1200_p0 = pnand %p1199_p13, %p1193_p10 }
  0x20   :  { %1203 = shalt.err (!%p1200_p0)
}
  0x21   :  { %s1235_s1 = smov 128   ;;  %s1236_s8 = smov 8  }
  0x22   :  { %48 = dma.hbm_to_vmem [thread:$0]  %s1488_s3, 2048, %s43_s28, [#allocation6], %s1235_s1, %s1235_s1, %s1236_s8  }
  0x23   :  { %1224 = dma.done.wait [#allocation3], 320  }
  0x24   :  { %1225 = vsyncadd [#allocation3], 4294966976 }
  0x25   :  { %1226 = dma.done.wait [#allocation6], 4096  }
  0x26   :  { %1227 = vsyncadd [#allocation6], 4294963200  ;;  %v243_v0 = vld [vmem:[#allocation2] sm:$0xff]  ;;  %v1093_v3 = vld [vmem:[#allocation2 + $0x8] ss:$0 sps:$4 sm:$0xff]   ;;  %vm199_vm0 = vcmask 1044480  }
  0x27   :  { %v858_v1 = vcombine.high %v243_v0, %v243_v0  ;;  %v1285_v2 = vcombine.low %v243_v0, %v243_v0  ;;  %v1287_v4 = vld [vmem:[#allocation5 + $0x78] sm:$0x1f]   ;;  %s1237_s0 = smov 78   ;;  %vm195_vm1 = vcmask 998400   ;;  %v1294_v6 = vld [vmem:[#allocation5 + $0x70] sm:$0xff]   ;;  %s1238_s3 = smov 28  }
  0x28   :  { %v1290_v5 = vld [vmem:[#allocation5 + $0x38] sm:$0xff]   ;;  %1067 = vmatprep.subr.msk.bf16.mxu0 %vm199_vm0, %v1287_v4  ;;  %1068 = vmatprep.subr.msk.bf16.mxu1 %vm199_vm0, %v1287_v4  ;;  %v1299_v7 = vld [vmem:[#allocation5 + $0x30] sm:$0xff]   ;;  %v1304_v8 = vld [vmem:[#allocation5 + $0x68] sm:$0xff]   ;;  %s1239_s11 = smov 106   ;;  %s1240_s12 = smov 56   ;;  %vm259_vm2 = vcmask 637952  }
  0x29   :  { %255 = vrot.lane.b32.xlu0 %v858_v1, %s1237_s0  ;;  %253 = vrot.lane.b32.xlu1 %v1285_v2, %s1237_s0  ;;  %v361_v9 = vld [vmem:[#allocation2 + $0x4] sm:$0xff]  ;;  %v1308_v10 = vld [vmem:[#allocation5 + $0x28] sm:$0xff]   ;;  %v1312_v11 = vld [vmem:[#allocation5 + $0x60] sm:$0xff]   ;;  %s1241_s13 = smov 6   ;;  %s1242_s14 = smov 84   ;;  %vm313_vm3 = vcmask 228352  }
  0x2a   :  { %892 = vmatpush3.bf16.msra.mxu0 %v1290_v5  ;;  %914 = vmatpush3.bf16.msra.mxu1 %v1290_v5  ;;  %v863_v12 = vcombine.high %v361_v9, %v361_v9  ;;  %v1095_v13 = vld [vmem:[#allocation2 + $0xc] ss:$0 sps:$4 sm:$0xff]   ;;  %v1317_v14 = vld [vmem:[#allocation5 + $0x20] sm:$0xff]   ;;  %v862_v16 = vcombine.low %v361_v9, %v361_v9  ;;  %v1329_v18 = vld [vmem:[#allocation5 + $0x50] sm:$0xff]   ;;  %s1243_s15 = smov 34   ;;  %vm377_vm4 = vcmask 867328  }
  0x2b   :  { %893 = vmatprep.subr.bf16.mxu0 %v1294_v6  ;;  %856 = vmatprep.mubr.msk.bf16.mxu0 %vm195_vm1, %v858_v1  ;;  %v1321_v15 = vld [vmem:[#allocation5 + $0x58] sm:$0xff]   ;;  %v1332_v19 = vld [vmem:[#allocation5 + $0x10] sm:$0xff]   ;;  %v1334_v20 = vld [vmem:[#allocation5 + $0x48] sm:$0xff]   ;;  %vm431_vm5 = vcmask 457728   ;;  %vm485_vm6 = vcmask 48128   ;;  %vm549_vm7 = vcmask 687104  }
  0x2c   :  { %915 = vmatprep.subr.bf16.mxu1 %v1294_v6  ;;  %v1325_v17 = vld [vmem:[#allocation5 + $0x18] sm:$0xff]   ;;  %v1341_v22 = vld [vmem:[#allocation5 + $0x8] sm:$0xff]   ;;  %v1345_v23 = vld [vmem:[#allocation5 + $0x40] sm:$0xff]   ;;  %vm603_vm8 = vcmask 277504  }
  0x2d   :  { %257 = vrot.lane.b32.xlu0 %v1093_v3, %s1237_s0  ;;  %309 = vrot.lane.b32.xlu1 %v858_v1, %s1238_s3  ;;  %v533_v21 = vld [vmem:[#allocation2 + $0x8] sm:$0xff]  ;;  %v1349_v25 = vld [vmem:[#allocation5] sm:$0xff]   ;;  %v1104_v26 = vld [vmem:[#allocation2 + $0x10] ss:$0 sps:$4 sm:$0xff]  }
  0x2e   :  { %894 = vmatpush3.bf16.msra.mxu0 %v1299_v7  ;;  %916 = vmatpush3.bf16.msra.mxu1 %v1299_v7  ;;  %v869_v24 = vcombine.high %v533_v21, %v533_v21  ;;  %v868_v27 = vcombine.low %v533_v21, %v533_v21  ;;  %v1122_v9 = vld [vmem:[#allocation7 + $0x50] ss:$8 sps:$4 sm:$0xff]  }
  0x2f   :  { %895 = vmatprep.subr.bf16.mxu0 %v1304_v8  ;;  %917 = vmatprep.subr.bf16.mxu1 %v1304_v8 }
  0x31   :  { %311 = vrot.lane.b32.xlu0 %v1093_v3, %s1238_s3  ;;  %307 = vrot.lane.b32.xlu1 %v1285_v2, %s1238_s3 }
  0x32   :  { %896 = vmatpush3.bf16.msra.mxu0 %v1308_v10  ;;  %918 = vmatpush3.bf16.msra.mxu1 %v1308_v10 }
  0x33   :  { %897 = vmatprep.subr.bf16.mxu0 %v1312_v11  ;;  %919 = vmatprep.subr.bf16.mxu1 %v1312_v11 }
  0x35   :  { %373 = vrot.lane.b32.xlu0 %v863_v12, %s1239_s11  ;;  %375 = vrot.lane.b32.xlu1 %v1095_v13, %s1239_s11 }
  0x36   :  { %898 = vmatpush3.bf16.msra.mxu0 %v1317_v14  ;;  %920 = vmatpush3.bf16.msra.mxu1 %v1317_v14 }
  0x37   :  { %899 = vmatprep.subr.bf16.mxu0 %v1321_v15  ;;  %921 = vmatprep.subr.bf16.mxu1 %v1321_v15 }
  0x39   :  { %371 = vrot.lane.b32.xlu0 %v862_v16, %s1239_s11  ;;  %427 = vrot.lane.b32.xlu1 %v863_v12, %s1240_s12 }
  0x3a   :  { %900 = vmatpush3.bf16.msra.mxu0 %v1325_v17  ;;  %922 = vmatpush3.bf16.msra.mxu1 %v1325_v17 }
  0x3b   :  { %901 = vmatprep.subr.bf16.mxu0 %v1329_v18  ;;  %923 = vmatprep.subr.bf16.mxu1 %v1329_v18 }
  0x3d   :  { %429 = vrot.lane.b32.xlu0 %v1095_v13, %s1240_s12  ;;  %425 = vrot.lane.b32.xlu1 %v862_v16, %s1240_s12 }
  0x3e   :  { %902 = vmatpush3.bf16.msra.mxu0 %v1332_v19  ;;  %924 = vmatpush3.bf16.msra.mxu1 %v1332_v19 }
  0x3f   :  { %903 = vmatprep.subr.bf16.mxu0 %v1334_v20  ;;  %925 = vmatprep.subr.bf16.mxu1 %v1334_v20 }
  0x41   :  { %481 = vrot.lane.b32.xlu0 %v863_v12, %s1241_s13  ;;  %483 = vrot.lane.b32.xlu1 %v1095_v13, %s1241_s13  ;;  %v1130_v12 = vld [vmem:[#allocation7 + $0x34] ss:$8 sps:$4 sm:$0xff]   ;;  %v1128_v13 = vld [vmem:[#allocation7 + $0x30] ss:$8 sps:$4 sm:$0xff]  }
  0x42   :  { %904 = vmatpush3.bf16.msra.mxu0 %v1341_v22  ;;  %926 = vmatpush3.bf16.msra.mxu1 %v1341_v22 }
  0x43   :  { %905 = vmatprep.subr.bf16.mxu0 %v1345_v23  ;;  %927 = vmatprep.subr.bf16.mxu1 %v1345_v23 }
  0x45   :  { %479 = vrot.lane.b32.xlu0 %v862_v16, %s1241_s13  ;;  %545 = vrot.lane.b32.xlu1 %v869_v24, %s1242_s14  ;;  %v1136_v16 = vld [vmem:[#allocation7 + $0x14] ss:$8 sps:$4 sm:$0xff]  }
  0x46   :  { %906 = vmatpush3.bf16.msra.mxu0 %v1349_v25  ;;  %928 = vmatpush3.bf16.msra.mxu1 %v1349_v25 }
  0x47   :  { %1069 = vmatprep.subr.msk.bf16.mxu0 %vm199_vm0, %v1287_v4  ;;  %1070 = vmatprep.subr.msk.bf16.mxu1 %vm199_vm0, %v1287_v4 }
  0x49   :  { %547 = vrot.lane.b32.xlu0 %v1104_v26, %s1242_s14  ;;  %543 = vrot.lane.b32.xlu1 %v868_v27, %s1242_s14 }
  0x4a   :  { %236 = vmatmul.mubr.bf16.vlgmr.msra.gmra.mxu0 %v1285_v2 }
  0x4b   :  { %936 = vmatpush3.bf16.msra.mxu0 %v1290_v5 }
  0x4c   :  { %937 = vmatprep.subr.bf16.mxu0 %v1294_v6 }
  0x4d   :  { %599 = vrot.lane.b32.xlu0 %v869_v24, %s1243_s15  ;;  %601 = vrot.lane.b32.xlu1 %v1104_v26, %s1243_s15 }
  0x4f   :  { %938 = vmatpush3.bf16.msra.mxu0 %v1299_v7 }
  0x50   :  { %939 = vmatprep.subr.bf16.mxu0 %v1304_v8 }
  0x51   :  { %597 = vrot.lane.b32.xlu0 %v868_v27, %s1243_s15 }
  0x53   :  { %940 = vmatpush3.bf16.msra.mxu0 %v1308_v10 }
  0x54   :  { %941 = vmatprep.subr.bf16.mxu0 %v1312_v11 }
  0x57   :  { %942 = vmatpush3.bf16.msra.mxu0 %v1317_v14 }
  0x58   :  { %943 = vmatprep.subr.bf16.mxu0 %v1321_v15 }
  0x5b   :  { %944 = vmatpush3.bf16.msra.mxu0 %v1325_v17 }
  0x5c   :  { %945 = vmatprep.subr.bf16.mxu0 %v1329_v18 }
  0x5f   :  { %946 = vmatpush3.bf16.msra.mxu0 %v1332_v19 }
  0x60   :  { %947 = vmatprep.subr.bf16.mxu0 %v1334_v20 }
  0x63   :  { %948 = vmatpush3.bf16.msra.mxu0 %v1341_v22 }
  0x64   :  { %949 = vmatprep.subr.bf16.mxu0 %v1345_v23 }
  0x67   :  { %950 = vmatpush3.bf16.msra.mxu0 %v1349_v25 }
  0x68   :  { %1071 = vmatprep.subr.msk.bf16.mxu0 %vm199_vm0, %v1287_v4 }
  0x9b   :  { %v256_v28 = vpop.permute.xlu0 %255  ;;  %v254_v29 = vpop.permute.xlu1 %253 }
  0x9c   :  { %v260_v33 = vsel %vm259_vm2, %v254_v29, %v256_v28 }
  0x9f   :  { %v258_v30 = vpop.permute.xlu0 %257  ;;  %v310_v31 = vpop.permute.xlu1 %309 }
  0xa0   :  { %v261_v32 = vsel %vm259_vm2, %v256_v28, %v258_v30 }
  0xa1   :  { %860 = vmatprep.mubr.msk.bf16.mxu1 %vm195_vm1, %v261_v32 }
  0xa2   :  { %299 = vmatmul.mubr.bf16.vlgmr.msra.gmra.mxu1 %v260_v33 }
  0xa3   :  { %958 = vmatpush3.bf16.msra.mxu1 %v1290_v5  ;;  %v312_v34 = vpop.permute.xlu0 %311  ;;  %v308_v35 = vpop.permute.xlu1 %307 }
  0xa4   :  { %v315_v36 = vsel %vm313_vm3, %v310_v31, %v312_v34  ;;  %v314_v37 = vsel %vm313_vm3, %v308_v35, %v310_v31  ;;  %959 = vmatprep.subr.bf16.mxu1 %v1294_v6 }
  0xa5   :  { %861 = vmatprep.mubr.msk.bf16.mxu0 %vm195_vm1, %v315_v36 }
  0xa6   :  { %353 = vmatmul.mubr.bf16.vlgmr.msra.gmra.mxu0 %v314_v37 }
  0xa7   :  { %960 = vmatpush3.bf16.msra.mxu1 %v1299_v7  ;;  %980 = vmatpush3.bf16.msra.mxu0 %v1290_v5  ;;  %v374_v38 = vpop.permute.xlu0 %373  ;;  %v376_v39 = vpop.permute.xlu1 %375 }
  0xa8   :  { %961 = vmatprep.subr.bf16.mxu1 %v1304_v8  ;;  %981 = vmatprep.subr.bf16.mxu0 %v1294_v6  ;;  %v379_v40 = vsel %vm377_vm4, %v374_v38, %v376_v39 }
  0xa9   :  { %865 = vmatprep.mubr.msk.bf16.mxu1 %vm195_vm1, %v379_v40 }
  0xab   :  { %962 = vmatpush3.bf16.msra.mxu1 %v1308_v10  ;;  %982 = vmatpush3.bf16.msra.mxu0 %v1299_v7  ;;  %v372_v41 = vpop.permute.xlu0 %371  ;;  %v428_v42 = vpop.permute.xlu1 %427 }
  0xac   :  { %963 = vmatprep.subr.bf16.mxu1 %v1312_v11  ;;  %983 = vmatprep.subr.bf16.mxu0 %v1304_v8  ;;  %v378_v49 = vsel %vm377_vm4, %v372_v41, %v374_v38 }
  0xaf   :  { %964 = vmatpush3.bf16.msra.mxu1 %v1317_v14  ;;  %984 = vmatpush3.bf16.msra.mxu0 %v1308_v10  ;;  %v430_v43 = vpop.permute.xlu0 %429  ;;  %v426_v46 = vpop.permute.xlu1 %425 }
  0xb0   :  { %965 = vmatprep.subr.bf16.mxu1 %v1321_v15  ;;  %985 = vmatprep.subr.bf16.mxu0 %v1312_v11  ;;  %v433_v44 = vsel %vm431_vm5, %v428_v42, %v430_v43  ;;  %v432_v51 = vsel %vm431_vm5, %v426_v46, %v428_v42 }
  0xb1   :  { %866 = vmatprep.mubr.msk.bf16.mxu0 %vm195_vm1, %v433_v44 }
  0xb3   :  { %966 = vmatpush3.bf16.msra.mxu1 %v1325_v17  ;;  %986 = vmatpush3.bf16.msra.mxu0 %v1317_v14  ;;  %v482_v45 = vpop.permute.xlu0 %481  ;;  %v484_v47 = vpop.permute.xlu1 %483 }
  0xb4   :  { %967 = vmatprep.subr.bf16.mxu1 %v1329_v18  ;;  %987 = vmatprep.subr.bf16.mxu0 %v1321_v15  ;;  %v487_v50 = vsel %vm485_vm6, %v482_v45, %v484_v47 }
  0xb7   :  { %968 = vmatpush3.bf16.msra.mxu1 %v1332_v19  ;;  %988 = vmatpush3.bf16.msra.mxu0 %v1325_v17  ;;  %v480_v48 = vpop.permute.xlu0 %479  ;;  %v546_v53 = vpop.permute.xlu1 %545 }
  0xb8   :  { %969 = vmatprep.subr.bf16.mxu1 %v1334_v20  ;;  %989 = vmatprep.subr.bf16.mxu0 %v1329_v18  ;;  %v486_v58 = vsel %vm485_vm6, %v480_v48, %v482_v45 }
  0xbb   :  { %970 = vmatpush3.bf16.msra.mxu1 %v1341_v22  ;;  %990 = vmatpush3.bf16.msra.mxu0 %v1332_v19  ;;  %v548_v52 = vpop.permute.xlu0 %547  ;;  %v544_v55 = vpop.permute.xlu1 %543 }
  0xbc   :  { %971 = vmatprep.subr.bf16.mxu1 %v1345_v23  ;;  %991 = vmatprep.subr.bf16.mxu0 %v1334_v20  ;;  %v551_v54 = vsel %vm549_vm7, %v546_v53, %v548_v52  ;;  %v550_v60 = vsel %vm549_vm7, %v544_v55, %v546_v53 }
  0xbf   :  { %972 = vmatpush3.bf16.msra.mxu1 %v1349_v25  ;;  %992 = vmatpush3.bf16.msra.mxu0 %v1341_v22  ;;  %v602_v56 = vpop.permute.xlu1 %601  ;;  %v600_v57 = vpop.permute.xlu0 %599 }
  0xc0   :  { %993 = vmatprep.subr.bf16.mxu0 %v1345_v23  ;;  %1072 = vmatprep.subr.msk.bf16.mxu1 %vm199_vm0, %v1287_v4  ;;  %v605_v59 = vsel %vm603_vm8, %v600_v57, %v602_v56 }
  0xc2   :  { %417 = vmatmul.mubr.bf16.vlgmr.msra.gmra.mxu1 %v378_v49 }
  0xc3   :  { %994 = vmatpush3.bf16.msra.mxu0 %v1349_v25  ;;  %1002 = vmatpush3.bf16.msra.mxu1 %v1290_v5  ;;  %v598_v61 = vpop.permute.xlu0 %597 }
  0xc4   :  { %1003 = vmatprep.subr.bf16.mxu1 %v1294_v6  ;;  %1073 = vmatprep.subr.msk.bf16.mxu0 %vm199_vm0, %v1287_v4  ;;  %v604_v62 = vsel %vm603_vm8, %v598_v61, %v600_v57 }
  0xc5   :  { %867 = vmatprep.mubr.msk.bf16.mxu1 %vm195_vm1, %v487_v50 }
  0xc6   :  { %471 = vmatmul.mubr.bf16.vlgmr.msra.gmra.mxu0 %v432_v51 }
  0xc7   :  { %1004 = vmatpush3.bf16.msra.mxu1 %v1299_v7  ;;  %1024 = vmatpush3.bf16.msra.mxu0 %v1290_v5 }
  0xc8   :  { %1005 = vmatprep.subr.bf16.mxu1 %v1304_v8  ;;  %1025 = vmatprep.subr.bf16.mxu0 %v1294_v6 }
  0xc9   :  { %871 = vmatprep.mubr.msk.bf16.mxu0 %vm195_vm1, %v551_v54 }
  0xcb   :  { %1006 = vmatpush3.bf16.msra.mxu1 %v1308_v10  ;;  %1026 = vmatpush3.bf16.msra.mxu0 %v1299_v7 }
  0xcc   :  { %1007 = vmatprep.subr.bf16.mxu1 %v1312_v11  ;;  %1027 = vmatprep.subr.bf16.mxu0 %v1304_v8 }
  0xcf   :  { %1008 = vmatpush3.bf16.msra.mxu1 %v1317_v14  ;;  %1028 = vmatpush3.bf16.msra.mxu0 %v1308_v10 }
  0xd0   :  { %1009 = vmatprep.subr.bf16.mxu1 %v1321_v15  ;;  %1029 = vmatprep.subr.bf16.mxu0 %v1312_v11 }
  0xd3   :  { %1010 = vmatpush3.bf16.msra.mxu1 %v1325_v17  ;;  %1030 = vmatpush3.bf16.msra.mxu0 %v1317_v14 }
  0xd4   :  { %1011 = vmatprep.subr.bf16.mxu1 %v1329_v18  ;;  %1031 = vmatprep.subr.bf16.mxu0 %v1321_v15 }
  0xd7   :  { %1012 = vmatpush3.bf16.msra.mxu1 %v1332_v19  ;;  %1032 = vmatpush3.bf16.msra.mxu0 %v1325_v17 }
  0xd8   :  { %1013 = vmatprep.subr.bf16.mxu1 %v1334_v20  ;;  %1033 = vmatprep.subr.bf16.mxu0 %v1329_v18 }
  0xdb   :  { %1014 = vmatpush3.bf16.msra.mxu1 %v1341_v22  ;;  %1034 = vmatpush3.bf16.msra.mxu0 %v1332_v19 }
  0xdc   :  { %1015 = vmatprep.subr.bf16.mxu1 %v1345_v23  ;;  %1035 = vmatprep.subr.bf16.mxu0 %v1334_v20 }
  0xdf   :  { %1016 = vmatpush3.bf16.msra.mxu1 %v1349_v25  ;;  %1036 = vmatpush3.bf16.msra.mxu0 %v1341_v22 }
  0xe0   :  { %1037 = vmatprep.subr.bf16.mxu0 %v1345_v23  ;;  %1074 = vmatprep.subr.msk.bf16.mxu1 %vm199_vm0, %v1287_v4  ;;  %v1116_v4 = vld [vmem:[#allocation7 + $0x70] ss:$8 sps:$4 sm:$0xff]  }
  0xe2   :  { %525 = vmatmul.mubr.bf16.vlgmr.msra.gmra.mxu1 %v486_v58 }
  0xe3   :  { %1038 = vmatpush3.bf16.msra.mxu0 %v1349_v25  ;;  %1046 = vmatpush3.bf16.msra.mxu1 %v1290_v5  ;;  %v1118_v5 = vld [vmem:[#allocation7 + $0x74] ss:$8 sps:$4 sm:$0xff]  }
  0xe4   :  { %1047 = vmatprep.subr.bf16.mxu1 %v1294_v6  ;;  %872 = vmatprep.mubr.msk.bf16.mxu1 %vm195_vm1, %v605_v59  ;;  %v1121_v6 = vld [vmem:[#allocation7 + $0x64] ss:$8 sps:$4 sm:$0xff]  }
  0xe5   :  { %769 = vmatprep.subr.bf16.mxu0 %v1118_v5 }
  0xe6   :  { %589 = vmatmul.mubr.bf16.vlgmr.msra.gmra.mxu0 %v550_v60  ;;  %v873_v60 = vld [vmem:[%s1487_s2] ss:$0 sm:$0xff]  ;;  %s1245_s2 = smov [#allocation8]  }
  0xe7   :  { %1048 = vmatpush3.bf16.msra.mxu1 %v1299_v7  ;;  %770 = vmatpush1.bf16.msra.mxu0 %v1116_v4  ;;  %v1119_v7 = vld [vmem:[#allocation7 + $0x60] ss:$8 sps:$4 sm:$0xff]   ;;  %s828_s20 = sshll.u32 %s1245_s2, 4  ;;  %s829_s20 = int_to_ptr.vmem [resolvable:$true] %s828_s20 }
  0xe8   :  { %1049 = vmatprep.subr.bf16.mxu1 %v1304_v8  ;;  %771 = vmatprep.subr.bf16.mxu0 %v1121_v6  ;;  %v1124_v8 = vld [vmem:[#allocation7 + $0x54] ss:$8 sps:$4 sm:$0xff]   ;;  %v677_v6 = vld [vmem:[%s1489_s4] sm:$0x3]  ;;  %s1204_s4 = scalar_lea.vmem %s829_s20, 128  ;;  %p1209_p2 = scmp.lt.s32.totalorder %s829_s20, %s829_s20 }
  0xe9   :  { %p1205_p1 = scmp.ne.s32.totalorder %s829_s20, %s1204_s4  ;;  %p1210_p3 = scmp.lt.s32.totalorder %s1204_s4, %s1204_s4 }
  0xeb   :  { %1050 = vmatpush3.bf16.msra.mxu1 %v1308_v10  ;;  %772 = vmatpush1.bf16.msra.mxu0 %v1119_v7  ;;  %v1127_v10 = vld [vmem:[#allocation7 + $0x44] ss:$8 sps:$4 sm:$0xff]   ;;  %p1211_p4 = por %p1210_p3, %p1209_p2 }
  0xec   :  { %1051 = vmatprep.subr.bf16.mxu1 %v1312_v11  ;;  %773 = vmatprep.subr.bf16.mxu0 %v1124_v8  ;;  %v1125_v11 = vld [vmem:[#allocation7 + $0x40] ss:$8 sps:$4 sm:$0xff]  }
  0xed   :  { %p1212_p5 = pnand %p1211_p4, %p1205_p1 }
  0xef   :  { %1052 = vmatpush3.bf16.msra.mxu1 %v1317_v14  ;;  %774 = vmatpush1.bf16.msra.mxu0 %v1122_v9  ;;  %v1133_v14 = vld [vmem:[#allocation7 + $0x24] ss:$8 sps:$4 sm:$0xff]  }
  0xf0   :  { %1053 = vmatprep.subr.bf16.mxu1 %v1321_v15  ;;  %775 = vmatprep.subr.bf16.mxu0 %v1127_v10  ;;  %v1131_v15 = vld [vmem:[#allocation7 + $0x20] ss:$8 sps:$4 sm:$0xff]  }
  0xf3   :  { %1054 = vmatpush3.bf16.msra.mxu1 %v1325_v17  ;;  %776 = vmatpush1.bf16.msra.mxu0 %v1125_v11  ;;  %v1134_v17 = vld [vmem:[#allocation7 + $0x10] ss:$8 sps:$4 sm:$0xff]  }
  0xf4   :  { %1055 = vmatprep.subr.bf16.mxu1 %v1329_v18  ;;  %777 = vmatprep.subr.bf16.mxu0 %v1130_v12  ;;  %v1139_v18 = vld [vmem:[#allocation7 + $0x4] ss:$8 sps:$4 sm:$0xff]  }
  0xf7   :  { %1056 = vmatpush3.bf16.msra.mxu1 %v1332_v19  ;;  %778 = vmatpush1.bf16.msra.mxu0 %v1128_v13  ;;  %v1137_v19 = vld [vmem:[#allocation7] ss:$8 sps:$4 sm:$0xff]  }
  0xf8   :  { %1057 = vmatprep.subr.bf16.mxu1 %v1334_v20  ;;  %779 = vmatprep.subr.bf16.mxu0 %v1133_v14  ;;  %v1244_v20 = vmov 0  }
  0xf9   :  { %801 = vmatprep.mubr.bf16.mxu0 %v1244_v20 }
  0xfb   :  { %1058 = vmatpush3.bf16.msra.mxu1 %v1341_v22  ;;  %780 = vmatpush1.bf16.msra.mxu0 %v1131_v15 }
  0xfc   :  { %1059 = vmatprep.subr.bf16.mxu1 %v1345_v23  ;;  %781 = vmatprep.subr.bf16.mxu0 %v1136_v16 }
  0xff   :  { %1060 = vmatpush3.bf16.msra.mxu1 %v1349_v25  ;;  %782 = vmatpush1.bf16.msra.mxu0 %v1134_v17 }
 0x100   :  { %783 = vmatprep.subr.bf16.mxu0 %v1139_v18 }
 0x102   :  { %643 = vmatmul.mubr.bf16.vlgmr.msra.gmra.mxu1 %v604_v62 }
 0x103   :  { %784 = vmatpush1.bf16.msra.mxu0 %v1137_v19 }
 0x10a   :  { %v907_v63 = vpop.f32.mrf.mxu0 }
 0x10c   :  { %v908_v0 = vpop.f32.mrf.mxu0 }
 0x10d   :  { %v909_v1 = vadd.f32 %v908_v0, %v907_v63 }
 0x10e   :  { %v910_v2 = vpop.f32.mrf.mxu0 }
 0x110   :  { %v911_v3 = vpop.f32.mrf.mxu0 }
 0x111   :  { %v679_v3 = vlaneseq }
 0x113   :  { %v680_v4 = vshrl.u32 %v679_v3, 7 }
 0x115   :  { %v685_v5 = vsub.s32 1, %v680_v4  ;;  %v681_v16 = vsub.s32 0, %v680_v4 }
 0x117   :  { %v686_v7 = vrot.slane %v677_v6, %v685_v5  ;;  %v682_v17 = vrot.slane %v677_v6, %v681_v16 }
 0x162   :  { %v929_v21 = vpop.f32.mrf.mxu1 }
 0x164   :  { %v930_v22 = vpop.f32.mrf.mxu1 }
 0x165   :  { %v931_v23 = vadd.f32 %v930_v22, %v929_v21 }
 0x166   :  { %v932_v24 = vpop.f32.mrf.mxu1  ;;  %v951_v25 = vpop.f32.mrf.mxu0 }
 0x167   :  { %v306_v26 = vmax.f32 %v909_v1, %v931_v23 }
 0x168   :  { %v933_v27 = vpop.f32.mrf.mxu1  ;;  %v952_v28 = vpop.f32.mrf.mxu0 }
 0x169   :  { %v953_v29 = vadd.f32 %v952_v28, %v951_v25 }
 0x16a   :  { %v954_v30 = vpop.f32.mrf.mxu0 }
 0x16b   :  { %v360_v31 = vmax.f32 %v306_v26, %v953_v29 }
 0x16c   :  { %v955_v32 = vpop.f32.mrf.mxu0 }
 0x182   :  { %v973_v33 = vpop.f32.mrf.mxu1 }
 0x184   :  { %v974_v34 = vpop.f32.mrf.mxu1 }
 0x185   :  { %v975_v49 = vadd.f32 %v974_v34, %v973_v33 }
 0x186   :  { %v976_v35 = vpop.f32.mrf.mxu1  ;;  %v995_v36 = vpop.f32.mrf.mxu0 }
 0x187   :  { %v424_v51 = vmax.f32 %v360_v31, %v975_v49 }
 0x188   :  { %v977_v37 = vpop.f32.mrf.mxu1  ;;  %v996_v38 = vpop.f32.mrf.mxu0 }
 0x189   :  { %v997_v50 = vadd.f32 %v996_v38, %v995_v36 }
 0x18a   :  { %v998_v39 = vpop.f32.mrf.mxu0 }
 0x18b   :  { %v478_v53 = vmax.f32 %v424_v51, %v997_v50 }
 0x18c   :  { %v999_v40 = vpop.f32.mrf.mxu0 }
 0x1a2   :  { %v1017_v41 = vpop.f32.mrf.mxu1 }
 0x1a4   :  { %v1018_v42 = vpop.f32.mrf.mxu1 }
 0x1a5   :  { %v1019_v52 = vadd.f32 %v1018_v42, %v1017_v41 }
 0x1a6   :  { %v1020_v43 = vpop.f32.mrf.mxu1  ;;  %v1039_v44 = vpop.f32.mrf.mxu0 }
 0x1a7   :  { %v532_v56 = vmax.f32 %v478_v53, %v1019_v52 }
 0x1a8   :  { %v1021_v45 = vpop.f32.mrf.mxu1  ;;  %v1040_v46 = vpop.f32.mrf.mxu0 }
 0x1a9   :  { %v1041_v54 = vadd.f32 %v1040_v46, %v1039_v44 }
 0x1aa   :  { %v1042_v47 = vpop.f32.mrf.mxu0 }
 0x1ab   :  { %v596_v58 = vmax.f32 %v532_v56, %v1041_v54 }
 0x1ac   :  { %v1043_v48 = vpop.f32.mrf.mxu0 }
 0x1c2   :  { %v1061_v55 = vpop.f32.mrf.mxu1 }
 0x1c4   :  { %v1062_v57 = vpop.f32.mrf.mxu1 }
 0x1c5   :  { %v1063_v59 = vadd.f32 %v1062_v57, %v1061_v55 }
 0x1c6   :  { %v1064_v61 = vpop.f32.mrf.mxu1 }
 0x1c7   :  { %v650_v62 = vmax.f32 %v596_v58, %v1063_v59 }
 0x1c8   :  { %v1065_v63 = vpop.f32.mrf.mxu1 }
 0x1c9   :  { %v658_v0 = vadd.f32 %v873_v60, %v650_v62 }
 0x1cb   :  { %v659_v1 = vmax.f32 %v658_v0, 0.0 }
 0x1cd   :  { %v660_v2 = vpack.c.bf16 %v659_v1, %v659_v1 }
 0x1cf   :  { %802 = vmatmul.mubr.bf16.vlgmr.msra.gmra.mxu0 %v660_v2 }
 0x28f   :  { %v803_v8 = vpop.f32.mrf.mxu0 }
 0x290   :  { %v804_v18 = vadd.f32 %v803_v8, %v682_v17 }
 0x291   :  { %v805_v9 = vpop.f32.mrf.mxu0 }
 0x292   :  { %v806_v10 = vadd.f32 %v805_v9, %v686_v7  ;;  %v810_v20 = vmax.f32 %v804_v18, 0.0 }
 0x293   :  { %v807_v11 = vpop.f32.mrf.mxu0 }
 0x294   :  { %v890_v12 = vmul.f32 -1.442695, %v806_v10 }
 0x295   :  { %v808_v13 = vpop.f32.mrf.mxu0 }
 0x296   :  { %1140 = vpow2.f32 %v890_v12 }
 0x2a3   :  { %v1141_v14 = vpop.eup %1140 }
 0x2a4   :  { %v814_v15 = vadd.f32 1.0, %v1141_v14 }
 0x2a6   :  { %1142 = vrcp.f32 %v814_v15 }
 0x2b3   :  { %v1143_v19 = vpop.eup %1142 }
 0x2b4   :  { %v818_v21 = vsub.f32 1.0, %v1143_v19  ;;  %v817_v22 = vmul.f32 %v1143_v19, %v810_v20 }
 0x2b6   :  { %v819_v23 = vmul.f32 %v818_v21, %v659_v1 }
 0x2b8   :  { %v820_v24 = vadd.f32 %v819_v23, %v817_v22 }
 0x2ba   :  { %821 = vst [vmem:[#allocation8] sm:$0xff] %v820_v24 }
 0x2bb   :  { %1215 = shalt.err (!%p1212_p5)
}
 0x2bc   :  { %831 = dma.vmem_to_hbm [thread:$0]  %s829_s20, 128, %s1490_s5, [#allocation4]  }
 0x2bd   :  { %1228 = dma.done.wait [#allocation4], 128  }
 0x2be   :  { %1229 = vsyncadd [#allocation4], 4294967168 }
 0x2bf   :  { %835 = vsyncpa [#allocation3], 1 }
 0x2c0   :  { %836 = vsyncpa [#allocation6], 1 }
 0x2c1   :  { %837 = vsyncpa [#allocation4], 1 }

</bundles_post_ra>
